<compile_context>
chip_gen: v6e
topology: v6e:2x2x1
jax: 0.10.0
libtpu: 0.0.40
codegen_flags: <defaults>
</compile_context>

<pallas_src>
import numpy as np
import jax
import jax.numpy as jnp
from jax.experimental import pallas as pl
from jax.experimental.pallas import tpu as pltpu


def _multitask_loss_kernel(losses_ref, log_vars_ref, c_ref, out_ref):
    losses = losses_ref[...]
    log_vars = log_vars_ref[...]
    c = c_ref[...]                      # c = log1p(is_regression), static constant
    # exp(-(log_vars + c)) == 1 / ((is_reg + 1) * exp(log_vars)) == coeffs
    # 0.5 * log_vars       == log(sqrt(exp(log_vars)))           == log(stds)
    out_ref[...] = losses * jnp.exp(-(log_vars + c)) + 0.5 * log_vars


def make_multi_task_loss(is_regression):
    """Build the forward fn. `is_regression` is a static (numpy) 0/1 buffer."""
    is_reg = np.asarray(is_regression, dtype=np.float32)
    n = is_reg.shape[0]

    # Static fold, done once host-side with numpy (no runtime XLA op):
    #   coeffs = exp(-log_vars) / (is_reg + 1) = exp(-(log_vars + log1p(is_reg)))
    c_const = jnp.asarray(np.log1p(is_reg).reshape(1, n))

    # Full-array (1, n) blocks: legal even when smaller than the (8,128) tile,
    # and avoids any padding / packing traffic for the common small n_tasks.
    spec = pl.BlockSpec((1, n), lambda: (0, 0), memory_space=pltpu.MemorySpace.VMEM)

    kernel = pl.pallas_call(
        _multitask_loss_kernel,
        out_shape=jax.ShapeDtypeStruct((1, n), jnp.float32),
        in_specs=[spec, spec, spec],
        out_specs=spec,
    )

    # TODO(synk): if n_tasks ever grows large, tile the lane axis with a grid
    # using >=512-wide lane blocks (ideally 1024-2048) and
    # dimension_semantics=("parallel",) so v7x can shard across its 2 TCs
    # (budget tiles against its 64 MiB VMEM / 32 MiB scoped default). At small
    # n_tasks the ideal answer on v7x is to let XLA fuse this expression into
    # the adjacent producer/consumer instead of a standalone call.
    def forward(losses, log_vars):
        out_dtype = losses.dtype
        out = kernel(
            losses.astype(jnp.float32).reshape(1, n),
            log_vars.astype(jnp.float32).reshape(1, n),
            c_const,
        )
        # The reference module returns the per-task vector (no .sum()).
        return out.reshape(n).astype(out_dtype)

    return forward


if __name__ == "__main__":
    key = jax.random.PRNGKey(0)
    k_losses, k_logvars = jax.random.split(key)

    n_tasks = 4
    # Static module buffer: which tasks are regression tasks.
    is_regression = np.array([1.0, 1.0, 0.0, 0.0], dtype=np.float32)
    # Learnable parameter (init is zeros; use nonzero values to exercise the math).
    log_vars = jax.random.uniform(k_logvars, (n_tasks,), dtype=jnp.float32,
                                  minval=-1.0, maxval=1.0)
    # Example per-task losses (positive, deterministic).
    losses = jax.random.uniform(k_losses, (n_tasks,), dtype=jnp.float32,
                                minval=0.1, maxval=2.0)

    forward = make_multi_task_loss(is_regression)
    out = jax.block_until_ready(forward(losses, log_vars))

    # Pure-JAX reference of the ORIGINAL (unsimplified) forward semantics.
    is_reg_j = jnp.asarray(is_regression)
    stds_ref = jnp.sqrt(jnp.exp(log_vars))
    coeffs_ref = 1.0 / ((is_reg_j + 1.0) * stds_ref ** 2)
    ref = coeffs_ref * losses + jnp.log(stds_ref)
    assert jnp.allclose(out, ref, rtol=1e-5, atol=1e-6), (out, ref)

    print("KERNEL_OK")
</pallas_src>

<mosaic_0001>
module attributes {stable_mosaic.version = 11 : i64} {
  func.func @_multitask_loss_kernel(%arg0: memref<1x4xf32, #tpu.memory_space<vmem>>, %arg1: memref<1x4xf32, #tpu.memory_space<vmem>>, %arg2: memref<1x4xf32, #tpu.memory_space<vmem>>, %arg3: memref<1x4xf32, #tpu.memory_space<vmem>>) attributes {dimension_semantics = [], scalar_prefetch = 0 : i64, scratch_operands = 0 : i64, tpu.core_type = #tpu.core_type<tc>} {
    %c0 = arith.constant 0 : index
    %c0_0 = arith.constant 0 : index
    %0 = vector.load %arg0[%c0, %c0_0] : memref<1x4xf32, #tpu.memory_space<vmem>>, vector<1x4xf32>
    %c0_1 = arith.constant 0 : index
    %c0_2 = arith.constant 0 : index
    %1 = vector.load %arg1[%c0_1, %c0_2] : memref<1x4xf32, #tpu.memory_space<vmem>>, vector<1x4xf32>
    %c0_3 = arith.constant 0 : index
    %c0_4 = arith.constant 0 : index
    %2 = vector.load %arg2[%c0_3, %c0_4] : memref<1x4xf32, #tpu.memory_space<vmem>>, vector<1x4xf32>
    %3 = arith.addf %1, %2 : vector<1x4xf32>
    %cst = arith.constant 0.000000e+00 : f32
    %4 = vector.broadcast %cst : f32 to vector<1x4xf32>
    %5 = arith.subf %4, %3 : vector<1x4xf32>
    %6 = math.exp %5 : vector<1x4xf32>
    %7 = arith.mulf %0, %6 : vector<1x4xf32>
    %cst_5 = arith.constant 5.000000e-01 : f32
    %8 = vector.broadcast %cst_5 : f32 to vector<1x4xf32>
    %9 = arith.mulf %8, %1 : vector<1x4xf32>
    %10 = arith.addf %7, %9 : vector<1x4xf32>
    %c0_6 = arith.constant 0 : index
    %c0_7 = arith.constant 0 : index
    %11 = vector.load %arg3[%c0_6, %c0_7] : memref<1x4xf32, #tpu.memory_space<vmem>>, vector<1x4xf32>
    tpu.vector_store %arg3[%c0_6, %c0_7], %10 {strides = array<i32>} : memref<1x4xf32, #tpu.memory_space<vmem>>, vector<1x4xf32>,
    return
  }
}

</mosaic_0001>

<bundles_post_ra>
// kernel: tpu_custom_call.1
= control target key start
LH: loop header
LB: loop body
LE: loop exit
PB: predicated region body
PF: predicated region fallthrough
CT: control target
= control target key end

     0   :  { %8 = vsyncpa [#allocation3], 0  ;;  %s136_s0 = inlined_call_operand.hbm [shape: f32[1,4], index: 0, kind: input, shape index: {}]   ;;  %s137_s1 = inlined_call_operand.vmem [shape: f32[1,4], index: 1, kind: input, shape index: {}]   ;;  %s138_s2 = inlined_call_operand.vmem [shape: f32[1,4], index: 2, kind: input, shape index: {}]   ;;  %s139_s3 = inlined_call_operand.hbm [shape: f32[1,4], index: 3, kind: output, shape index: {}]  }
   0x1   :  { %9 = vsyncpa [#allocation4], 0  ;;  %s102_s12 = smov [#allocation2]  }
   0x2   :  { %s16_s13 = sshll.u32 %s102_s12, 4  ;;  %s17_s13 = int_to_ptr.vmem [resolvable:$true] %s16_s13 }
   0x3   :  { %s66_s14 = scalar_lea.vmem %s17_s13, 16  ;;  %s70_s15 = scalar_lea.vmem %s17_s13, 32 }
   0x4   :  { %p67_p0 = scmp.ne.s32.totalorder %s17_s13, %s66_s14  ;;  %p71_p1 = scmp.lt.s32.totalorder %s17_s13, %s17_s13 }
   0x5   :  { %p72_p2 = scmp.lt.s32.totalorder %s70_s15, %s66_s14 }
   0x7   :  { %p73_p3 = por %p72_p2, %p71_p1 }
   0x9   :  { %p74_p4 = pnand %p73_p3, %p67_p0 }
   0xb   :  { %77 = shalt.err (!%p74_p4)
}
   0xc   :  { %19 = dma.hbm_to_vmem [thread:$0]  %s136_s0, 16, %s17_s13, [#allocation3]  }
   0xd   :  { %98 = dma.done.wait [#allocation3], 16  }
   0xe   :  { %99 = vsyncadd [#allocation3], 4294967280  ;;  %v28_v0 = vld [vmem:[%s137_s1] sm:$0x1]  ;;  %s103_s22 = smov [#allocation5]   ;;  %vm37_vm0 = vcmask 24576  }
   0xf   :  { %v29_v1 = vld [vmem:[%s138_s2] sm:$0x1]  ;;  %v35_v6 = vmul.f32 0.5, %v28_v0  ;;  %s45_s23 = sshll.u32 %s103_s22, 4  ;;  %s46_s23 = int_to_ptr.vmem [resolvable:$true] %s45_s23 }
  0x10   :  { %v30_v2 = vadd.f32 %v29_v1, %v28_v0  ;;  %v27_v5 = vld [vmem:[#allocation2] sm:$0x1]  ;;  %s78_s0 = scalar_lea.vmem %s46_s23, 16  ;;  %s82_s1 = scalar_lea.vmem %s46_s23, 32 }
  0x11   :  { %p79_p5 = scmp.ne.s32.totalorder %s46_s23, %s78_s0  ;;  %p83_p6 = scmp.lt.s32.totalorder %s46_s23, %s46_s23 }
  0x12   :  { %v31_v3 = vsub.f32 0.0, %v30_v2  ;;  %p84_p7 = scmp.lt.s32.totalorder %s82_s1, %s78_s0 }
  0x14   :  { %v32_v4 = vmul.f32 1.442695, %v31_v3  ;;  %p85_p8 = por %p84_p7, %p83_p6 }
  0x16   :  { %56 = vpow2.f32 %v32_v4  ;;  %p86_p9 = pnand %p85_p8, %p79_p5 }
  0x23   :  { %v57_v7 = vpop.eup %56 }
  0x24   :  { %v34_v8 = vmul.f32 %v57_v7, %v27_v5 }
  0x26   :  { %v36_v9 = vadd.f32 %v35_v6, %v34_v8 }
  0x28   :  { %38 = vst.msk [vmem:[#allocation5] sm:$0x1] %vm37_vm0, %v36_v9 }
  0x29   :  { %89 = shalt.err (!%p86_p9)
}
  0x2a   :  { %48 = dma.vmem_to_hbm [thread:$0]  %s46_s23, 16, %s139_s3, [#allocation4]  }
  0x2b   :  { %100 = dma.done.wait [#allocation4], 16  }
  0x2c   :  { %101 = vsyncadd [#allocation4], 4294967280 }
  0x2d   :  { %52 = vsyncpa [#allocation3], 1 }
  0x2e   :  { %53 = vsyncpa [#allocation4], 1 }

</bundles_post_ra>
